<compile_context>
chip_gen: v7x
topology: tpu7x:2x2x1
jax: 0.10.0
libtpu: 0.0.40
codegen_flags: <defaults>
</compile_context>

<pallas_src>
import functools

import jax
import jax.numpy as jnp
from jax.experimental import pallas as pl
from jax.experimental.pallas import tpu as pltpu


def _round_up(v, m):
    return ((v + m - 1) // m) * m


def _patch_embed_kernel(x_ref, w_ref, b_ref, o_ref):
    # x_ref: (tm, Kp)  patch row-tile (bf16 or f32)
    # w_ref: (Kp, Ep)  flattened conv weight, VMEM-resident across the grid
    # b_ref: (1, Ep)   f32 conv bias, VMEM-resident
    # o_ref: (tm, Ep)
    acc = jnp.dot(x_ref[...], w_ref[...], preferred_element_type=jnp.float32)
    o_ref[...] = (acc + b_ref[...]).astype(o_ref.dtype)


def patch_embedding(x, weight, bias, patch_size, *, tm=256,
                    compute_dtype=jnp.bfloat16):
    """x: (B, C, H, W) NCHW, weight: (E, C, P, P), bias: (E,) -> (B, N, E)."""
    B, C, H, W = x.shape
    E = weight.shape[0]
    P = patch_size
    assert H % P == 0 and W % P == 0, "image size must be divisible by patch size"
    Hp, Wp = H // P, W // P
    N = Hp * Wp
    K = C * P * P
    M = B * N
    out_dtype = x.dtype

    # --- glue (layout only): extract non-overlapping patches, (c, ph, pw) order.
    # (B, C, Hp, P, Wp, P) -> (B, Hp, Wp, C, P, P) -> (M, K)
    # TODO(synk): this transpose materializes an HBM copy of the input; folding
    # it into the pallas_call input DMA (allow_input_fusion / BlockSpec-driven
    # strided gather over the 6-D view) would halve HBM traffic on v6e/v7x.
    xp = x.reshape(B, C, Hp, P, Wp, P)
    xp = jnp.transpose(xp, (0, 2, 4, 1, 3, 5)).reshape(M, K)

    # conv weight (E, C, P, P) -> (K, E) so the matmul reproduces the conv.
    w2d = weight.reshape(E, K).T

    # --- pad to TPU-friendly shapes: last dims multiples of 128 (lane-dense),
    # row-tile a multiple of 8 sublanes. Zero padding is exact (zero rows of
    # w2d kill the padded-K columns of xp; padded-M rows are sliced away).
    Kp = _round_up(K, 128)
    Ep = _round_up(E, 128)
    tm = min(_round_up(tm, 8), _round_up(M, 8))
    Mp = _round_up(M, tm)

    xp = jnp.pad(xp, ((0, Mp - M), (0, Kp - K))).astype(compute_dtype)
    w2d = jnp.pad(w2d, ((0, Kp - K), (0, Ep - E))).astype(compute_dtype)
    b2d = jnp.pad(bias.astype(jnp.float32), (0, Ep - E)).reshape(1, Ep)

    grid = (Mp // tm,)

    # VMEM budget: double-buffered patch tiles + output tiles, resident weight
    # and bias (2 buffers are still allocated for them).
    in_bytes = jnp.dtype(compute_dtype).itemsize
    out_bytes = jnp.dtype(out_dtype).itemsize
    vmem_needed = (2 * tm * Kp * in_bytes          # streamed patch row-tiles
                   + 2 * Kp * Ep * in_bytes        # resident weight
                   + 2 * Ep * 4                    # resident bias
                   + 2 * tm * Ep * out_bytes)      # streamed output tiles
    # Lift the v5e(16 MiB)/v6e(32 MiB) scoped defaults while staying well under
    # v7x's 64 MiB physical VMEM.
    vmem_limit = int(min(max(2 * vmem_needed, 16 * 2**20), 48 * 2**20))

    out = pl.pallas_call(
        _patch_embed_kernel,
        out_shape=jax.ShapeDtypeStruct((Mp, Ep), out_dtype),
        grid_spec=pltpu.PrefetchScalarGridSpec(
            num_scalar_prefetch=0,
            grid=grid,
            in_specs=[
                pl.BlockSpec((tm, Kp), lambda i: (i, 0)),   # streamed row-tiles
                pl.BlockSpec((Kp, Ep), lambda i: (0, 0)),   # weight stays resident
                pl.BlockSpec((1, Ep), lambda i: (0, 0)),    # bias stays resident
            ],
            out_specs=pl.BlockSpec((tm, Ep), lambda i: (i, 0)),
        ),
        compiler_params=pltpu.CompilerParams(
            # Shards independent row-tiles across v7x's 2 TensorCores; harmless
            # (single TC) on v5e/v6e.
            dimension_semantics=("parallel",),
            vmem_limit_bytes=vmem_limit,
        ),
    )(xp, w2d, b2d)

    return out[:M, :E].reshape(B, N, E)


def _reference(x, weight, bias, patch_size, compute_dtype=None):
    """Pure-JAX reference of the PyTorch forward (stride-P conv + flatten + permute)."""
    if compute_dtype is not None:
        x = x.astype(compute_dtype)
        weight = weight.astype(compute_dtype)
    y = jax.lax.conv_general_dilated(
        x, weight,
        window_strides=(patch_size, patch_size),
        padding="VALID",
        dimension_numbers=("NCHW", "OIHW", "NCHW"),
        preferred_element_type=jnp.float32,
    )
    y = y + bias[None, :, None, None].astype(jnp.float32)
    B, E, Hp, Wp = y.shape
    return jnp.transpose(y.reshape(B, E, Hp * Wp), (0, 2, 1))


if __name__ == "__main__":
    # Small shapes consistent with the module:
    # batch=2, in_channels=4, image 16x16, patch_size=8 -> N=4 patches, E=32.
    B, C, Himg, Wimg = 2, 4, 16, 16
    P = 8
    E = 32

    key = jax.random.PRNGKey(0)
    kx, kw, kb, kx2, kw2, kb2 = jax.random.split(key, 6)

    x = jax.random.normal(kx, (B, C, Himg, Wimg), dtype=jnp.float32)
    weight = jax.random.normal(kw, (E, C, P, P), dtype=jnp.float32) * 0.02
    bias = jax.random.normal(kb, (E,), dtype=jnp.float32) * 0.02

    # --- exact-f32 path vs conv reference.
    fn_f32 = jax.jit(functools.partial(
        patch_embedding, patch_size=P, compute_dtype=jnp.float32))
    out_f32 = jax.block_until_ready(fn_f32(x, weight, bias))
    ref_f32 = _reference(x, weight, bias, P)
    assert out_f32.shape == (B, (Himg // P) * (Wimg // P), E), out_f32.shape
    assert jnp.allclose(out_f32, ref_f32, atol=1e-4, rtol=1e-4), "f32 mismatch"

    # --- default bf16 fast path vs a bf16-input conv reference (f32 accum).
    fn_bf16 = jax.jit(functools.partial(patch_embedding, patch_size=P))
    out_bf16 = jax.block_until_ready(fn_bf16(x, weight, bias))
    ref_bf16 = _reference(x, weight, bias, P, compute_dtype=jnp.bfloat16)
    assert jnp.allclose(out_bf16, ref_bf16, atol=5e-3, rtol=5e-3), "bf16 mismatch"

    # --- multi-step grid with K/E/M padding (M=48, tm=32 -> Mp=64, grid=(2,)).
    B2, C2, H2, P2, E2 = 3, 3, 16, 4, 40
    x2 = jax.random.normal(kx2, (B2, C2, H2, H2), dtype=jnp.float32)
    w2 = jax.random.normal(kw2, (E2, C2, P2, P2), dtype=jnp.float32) * 0.02
    b2 = jax.random.normal(kb2, (E2,), dtype=jnp.float32) * 0.02
    fn_tiled = jax.jit(functools.partial(
        patch_embedding, patch_size=P2, tm=32, compute_dtype=jnp.float32))
    out2 = jax.block_until_ready(fn_tiled(x2, w2, b2))
    ref2 = _reference(x2, w2, b2, P2)
    assert out2.shape == (B2, (H2 // P2) * (H2 // P2), E2), out2.shape
    assert jnp.allclose(out2, ref2, atol=1e-4, rtol=1e-4), "tiled-grid mismatch"

    print("KERNEL_OK")
</pallas_src>

<mosaic_0001>
module attributes {stable_mosaic.version = 11 : i64} {
  func.func @_patch_embed_kernel(%arg0: i32, %arg1: memref<8x256xf32, #tpu.memory_space<vmem>>, %arg2: memref<256x128xf32, #tpu.memory_space<vmem>>, %arg3: memref<1x128xf32, #tpu.memory_space<vmem>>, %arg4: memref<8x128xf32, #tpu.memory_space<vmem>>) attributes {dimension_semantics = [#tpu.dimension_semantics<parallel>], iteration_bounds = array<i64: 1>, scalar_prefetch = 0 : i64, scratch_operands = 0 : i64, tpu.core_type = #tpu.core_type<tc>, window_params = [{transform_indices = @transform_0, window_bounds = array<i64: 8, 256>}, {pipeline_mode = #tpu.pipeline_mode<synchronous>, transform_indices = @transform_1, window_bounds = array<i64: 256, 128>}, {pipeline_mode = #tpu.pipeline_mode<synchronous>, transform_indices = @transform_2, window_bounds = array<i64: 1, 128>}, {transform_indices = @transform_3, window_bounds = array<i64: 8, 128>}]} {
    %c0 = arith.constant 0 : index
    %c0_0 = arith.constant 0 : index
    %0 = vector.load %arg1[%c0, %c0_0] : memref<8x256xf32, #tpu.memory_space<vmem>>, vector<8x256xf32>
    %c0_1 = arith.constant 0 : index
    %c0_2 = arith.constant 0 : index
    %1 = vector.load %arg2[%c0_1, %c0_2] : memref<256x128xf32, #tpu.memory_space<vmem>>, vector<256x128xf32>
    %cst = arith.constant dense<0.000000e+00> : vector<8x128xf32>
    %2 = tpu.matmul %0, %1, %cst {dimension_numbers = #tpu.dot_dimension_numbers<[1], [0], [0], [1], [0, 0, 1, 1], [], []>} : vector<8x256xf32>, vector<256x128xf32>, vector<8x128xf32> -> vector<8x128xf32>
    %c0_3 = arith.constant 0 : index
    %c0_4 = arith.constant 0 : index
    %3 = vector.load %arg3[%c0_3, %c0_4] : memref<1x128xf32, #tpu.memory_space<vmem>>, vector<1x128xf32>
    %4 = vector.broadcast %3 : vector<1x128xf32> to vector<8x128xf32>
    %5 = arith.addf %2, %4 : vector<8x128xf32>
    %c0_5 = arith.constant 0 : index
    %c0_6 = arith.constant 0 : index
    %6 = vector.load %arg4[%c0_5, %c0_6] : memref<8x128xf32, #tpu.memory_space<vmem>>, vector<8x128xf32>
    tpu.vector_store %arg4[%c0_5, %c0_6], %5 {strides = array<i32>} : memref<8x128xf32, #tpu.memory_space<vmem>>, vector<8x128xf32>,
    return
  }
  func.func @transform_0(%arg0: i32) -> (i32, i32) {
    %c0_i32 = arith.constant 0 : i32
    %c0_i32_0 = arith.constant 0 : i32
    return %arg0, %c0_i32 : i32, i32
  }
  func.func @transform_1(%arg0: i32) -> (i32, i32) {
    %c0_i32 = arith.constant 0 : i32
    %c0_i32_0 = arith.constant 0 : i32
    %c0_i32_1 = arith.constant 0 : i32
    return %c0_i32, %c0_i32_0 : i32, i32
  }
  func.func @transform_2(%arg0: i32) -> (i32, i32) {
    %c0_i32 = arith.constant 0 : i32
    %c0_i32_0 = arith.constant 0 : i32
    %c0_i32_1 = arith.constant 0 : i32
    return %c0_i32, %c0_i32_0 : i32, i32
  }
  func.func @transform_3(%arg0: i32) -> (i32, i32) {
    %c0_i32 = arith.constant 0 : i32
    %c0_i32_0 = arith.constant 0 : i32
    return %arg0, %c0_i32 : i32, i32
  }
}

</mosaic_0001>

<bundles_post_ra>
// kernel: patch_embedding.1
= control target key start
LH: loop header
LB: loop body
LE: loop exit
PB: predicated region body
PF: predicated region fallthrough
CT: control target
= control target key end

     0   :  { %s372_s0 = inlined_call_operand.vmem [shape: f32[8,256], index: 0, kind: input, shape index: {}]   ;;  %s373_s1 = inlined_call_operand.vmem [shape: f32[256,128], index: 1, kind: input, shape index: {}]   ;;  %s374_s2 = inlined_call_operand.vmem [shape: f32[1,128], index: 2, kind: input, shape index: {}]   ;;  %s375_s3 = inlined_call_operand.hbm [shape: f32[8,128], index: 3, kind: output, shape index: {}]  }
   0x1   :  { %v33_v0 = vld [vmem:[%s373_s1 + $0x80] sm:$0xff]  ;;  %v34_v1 = vld [vmem:[%s373_s1 + $0x88] sm:$0xff]  ;;  %v35_v5 = vld [vmem:[%s373_s1 + $0x90] sm:$0xff] }
   0x2   :  { %v17_v2 = vld [vmem:[%s373_s1] sm:$0xff]  ;;  %v177_v3 = vpack.c.bf16 %v34_v1, %v33_v0  ;;  %v18_v4 = vld [vmem:[%s373_s1 + $0x8] sm:$0xff]  ;;  %v36_v6 = vld [vmem:[%s373_s1 + $0x98] sm:$0xff] }
   0x3   :  { %v179_v7 = vpack.c.bf16 %v18_v4, %v17_v2  ;;  %v181_v8 = vpack.c.bf16 %v36_v6, %v35_v5  ;;  %v19_v9 = vld [vmem:[%s373_s1 + $0x10] sm:$0xff]  ;;  %v20_v10 = vld [vmem:[%s373_s1 + $0x18] sm:$0xff]  ;;  %v37_v11 = vld [vmem:[%s373_s1 + $0xa0] sm:$0xff] }
   0x4   :  { %178 = vmatprep.subr.bf16.mxu0 %v177_v3  ;;  %v38_v12 = vld [vmem:[%s373_s1 + $0xa8] sm:$0xff]  ;;  %v183_v13 = vpack.c.bf16 %v20_v10, %v19_v9  ;;  %v21_v15 = vld [vmem:[%s373_s1 + $0x20] sm:$0xff]  ;;  %v39_v17 = vld [vmem:[%s373_s1 + $0xb0] sm:$0xff] }
   0x5   :  { %180 = vmatpush3.bf16.msra.mxu0 %v179_v7  ;;  %v185_v14 = vpack.c.bf16 %v38_v12, %v37_v11  ;;  %v22_v16 = vld [vmem:[%s373_s1 + $0x28] sm:$0xff]  ;;  %v40_v18 = vld [vmem:[%s373_s1 + $0xb8] sm:$0xff]  ;;  %v23_v21 = vld [vmem:[%s373_s1 + $0x30] sm:$0xff] }
   0x6   :  { %182 = vmatprep.subr.bf16.mxu0 %v181_v8  ;;  %v187_v19 = vpack.c.bf16 %v22_v16, %v21_v15  ;;  %v189_v20 = vpack.c.bf16 %v40_v18, %v39_v17  ;;  %v24_v22 = vld [vmem:[%s373_s1 + $0x38] sm:$0xff]  ;;  %v41_v23 = vld [vmem:[%s373_s1 + $0xc0] sm:$0xff]  ;;  %v42_v24 = vld [vmem:[%s373_s1 + $0xc8] sm:$0xff] }
   0x7   :  { %v16_v25 = vld [vmem:[%s372_s0 + $0x8] sm:$0xff] }
   0x8   :  { %120 = vmatprep.mubr.f32.mxu0 %v16_v25 }
   0x9   :  { %184 = vmatpush3.bf16.msra.mxu0 %v183_v13 }
   0xa   :  { %186 = vmatprep.subr.bf16.mxu0 %v185_v14 }
   0xb   :  { %8 = vsyncpa [#allocation3], 0  ;;  %v191_v26 = vpack.c.bf16 %v24_v22, %v23_v21  ;;  %v193_v27 = vpack.c.bf16 %v42_v24, %v41_v23  ;;  %v25_v28 = vld [vmem:[%s373_s1 + $0x40] sm:$0xff]  ;;  %v26_v29 = vld [vmem:[%s373_s1 + $0x48] sm:$0xff]  ;;  %s234_s28 = smov [#allocation2]  }
   0xc   :  { %v43_v30 = vld [vmem:[%s373_s1 + $0xd0] sm:$0xff]  ;;  %v44_v31 = vld [vmem:[%s373_s1 + $0xd8] sm:$0xff]  ;;  %v195_v32 = vpack.c.bf16 %v26_v29, %v25_v28  ;;  %v45_v36 = vld [vmem:[%s373_s1 + $0xe0] sm:$0xff]  ;;  %s133_s29 = sshll.u32 %s234_s28, 4  ;;  %s134_s29 = int_to_ptr.vmem [resolvable:$true] %s133_s29 }
   0xd   :  { %188 = vmatpush3.bf16.msra.mxu0 %v187_v19  ;;  %v197_v33 = vpack.c.bf16 %v44_v31, %v43_v30  ;;  %v27_v34 = vld [vmem:[%s373_s1 + $0x50] sm:$0xff]  ;;  %v28_v35 = vld [vmem:[%s373_s1 + $0x58] sm:$0xff]  ;;  %v46_v37 = vld [vmem:[%s373_s1 + $0xe8] sm:$0xff]  ;;  %p215_p1 = scmp.lt.s32.totalorder %s134_s29, %s134_s29 }
   0xe   :  { %190 = vmatprep.subr.bf16.mxu0 %v189_v20  ;;  %v199_v38 = vpack.c.bf16 %v28_v35, %v27_v34  ;;  %v201_v39 = vpack.c.bf16 %v46_v37, %v45_v36  ;;  %v29_v40 = vld [vmem:[%s373_s1 + $0x60] sm:$0xff]  ;;  %v30_v41 = vld [vmem:[%s373_s1 + $0x68] sm:$0xff]  ;;  %v47_v42 = vld [vmem:[%s373_s1 + $0xf0] sm:$0xff] }
   0xf   :  { %v48_v43 = vld [vmem:[%s373_s1 + $0xf8] sm:$0xff]  ;;  %v203_v44 = vpack.c.bf16 %v30_v41, %v29_v40  ;;  %v31_v46 = vld [vmem:[%s373_s1 + $0x70] sm:$0xff]  ;;  %v15_v49 = vld [vmem:[%s372_s0] sm:$0xff] }
  0x10   :  { %v205_v45 = vpack.c.bf16 %v48_v43, %v47_v42  ;;  %v32_v47 = vld [vmem:[%s373_s1 + $0x78] sm:$0xff]  ;;  %v141_v52 = vld [vmem:[%s374_s2] ss:$0 sm:$0xff]  ;;  %s210_s1 = scalar_lea.vmem %s134_s29, 128 }
  0x11   :  { %192 = vmatpush3.bf16.msra.mxu0 %v191_v26  ;;  %v207_v48 = vpack.c.bf16 %v32_v47, %v31_v46  ;;  %p211_p0 = scmp.ne.s32.totalorder %s134_s29, %s210_s1  ;;  %p216_p2 = scmp.lt.s32.totalorder %s210_s1, %s210_s1 }
  0x12   :  { %194 = vmatprep.subr.bf16.mxu0 %v193_v27 }
  0x13   :  { %p217_p3 = por %p216_p2, %p215_p1 }
  0x15   :  { %196 = vmatpush3.bf16.msra.mxu0 %v195_v32  ;;  %p218_p4 = pnand %p217_p3, %p211_p0 }
  0x16   :  { %198 = vmatprep.subr.bf16.mxu0 %v197_v33 }
  0x19   :  { %200 = vmatpush3.bf16.msra.mxu0 %v199_v38 }
  0x1a   :  { %202 = vmatprep.subr.bf16.mxu0 %v201_v39 }
  0x1d   :  { %204 = vmatpush3.bf16.msra.mxu0 %v203_v44 }
  0x1e   :  { %206 = vmatprep.subr.bf16.mxu0 %v205_v45 }
  0x21   :  { %208 = vmatpush3.bf16.msra.mxu0 %v207_v48 }
  0x24   :  { %121 = vmatmul.mubr.f32.vlgmr.msra.gmra.mrb[0].mxu0 %v15_v49 }
  0xf7   :  { %v174_v50 = vpop.f32.mrb[0].mxu0 }
  0xf8   :  { %v175_v51 = vpop.f32.mrb[1].mxu0 }
  0xf9   :  { %v176_v53 = vadd.f32 %v175_v51, %v174_v50 }
  0xfb   :  { %v123_v54 = vadd.f32 %v176_v53, %v141_v52 }
  0xfd   :  { %126 = vst [vmem:[#allocation2] sm:$0xff] %v123_v54 }
  0xfe   :  { %221 = shalt.err (!%p218_p4)
}
  0xff   :  { %s222_s4 = scalar_lea.hbm %s375_s3, 128 }
 0x100   :  { %p223_p5 = scmp.ne.s32.totalorder %s375_s3, %s222_s4  ;;  %p226_p6 = scmp.lt.u32.totalorder %s222_s4, %s375_s3 }
 0x102   :  { %p228_p7 = pnand %p226_p6, %p223_p5 }
 0x104   :  { %231 = shalt.err (!%p228_p7)
}
 0x105   :  { %136 = dma.vmem_to_hbm [thread:$0]  %s134_s29, 128, %s375_s3, [#allocation3]  }
 0x106   :  { %232 = dma.done.wait [#allocation3], 128  }
 0x107   :  { %233 = vsyncadd [#allocation3], 4294967168 }
 0x108   :  { %140 = vsyncpa [#allocation3], 1 }

</bundles_post_ra>
